<compile_context>
chip_gen: v7x
topology: tpu7x:2x2x1
jax: 0.10.0
libtpu: 0.0.40
codegen_flags: <defaults>
</compile_context>

<pallas_src>
import jax
import jax.numpy as jnp
from jax.experimental import pallas as pl
from jax.experimental.pallas import tpu as pltpu

SD_PAD = 8  # state_dim (4) padded to a sublane multiple; row `state_dim` carries the 1s for b1


def critic_kernel(x_ref, p_ref, o_ref):
    # x_ref : (SD_PAD, TB)   batch on the lane axis; rows [0:state_dim] = features,
    #                        row state_dim = 1.0 (drives the fc1 bias), remaining rows = 0.
    # p_ref : (hidden + 1, hidden)  packed parameters:
    #           p[:hidden, :SD_PAD] = [ W1 | b1 | 0-pad ]   (fc1, PyTorch (out, in) layout)
    #           p[0,       SD_PAD ] = b2                    (fc2 bias scalar)
    #           p[hidden,  :hidden] = w2                    (fc2 weight row)
    # o_ref : (1, TB)   lane-dense value row
    sdp = x_ref.shape[0]
    hidden = p_ref.shape[1]

    x = x_ref[...]                                   # (SD_PAD, TB)
    w1b1 = p_ref[:hidden, :sdp]                      # (hidden, SD_PAD)  W1 | b1 | zeros
    w2 = p_ref[hidden:hidden + 1, :]                 # (1, hidden)
    b2 = p_ref[0:1, sdp:sdp + 1]                     # (1, 1)

    # fc1 (+ bias) and ReLU: one small-K MXU matmul; bias rides the 1-row of x.
    h = jnp.maximum(
        jnp.dot(w1b1, x, preferred_element_type=jnp.float32), 0.0
    )                                                # (hidden, TB)
    # fc2: M=1 MXU matmul -> lane-dense (1, TB) row; add the scalar bias.
    v = jnp.dot(w2, h, preferred_element_type=jnp.float32) + b2   # (1, TB)
    o_ref[...] = v.astype(o_ref.dtype)


def pack_critic_params(fc1_w, fc1_b, fc2_w, fc2_b):
    """One-time repack of PyTorch-layout Linear params for the kernel.

    fc1_w: (hidden, state_dim)   fc1_b: (hidden,)
    fc2_w: (1, hidden)           fc2_b: (1,)
    Returns packed params of shape (hidden + 1, hidden) float32.
    """
    hidden, state_dim = fc1_w.shape
    assert state_dim + 1 <= SD_PAD and SD_PAD + 1 <= hidden
    p = jnp.zeros((hidden + 1, hidden), jnp.float32)
    p = p.at[:hidden, :state_dim].set(jnp.asarray(fc1_w, jnp.float32))
    p = p.at[:hidden, state_dim].set(jnp.asarray(fc1_b, jnp.float32))
    p = p.at[0, SD_PAD].set(jnp.asarray(fc2_b, jnp.float32).reshape(()))
    p = p.at[hidden, :hidden].set(jnp.asarray(fc2_w, jnp.float32).reshape(hidden))
    return p


def _round_up(n, m):
    return (n + m - 1) // m * m


def _prep_x(x, padded_batch):
    """(B, state_dim) -> (SD_PAD, padded_batch): transpose, append the 1-row that
    carries the fc1 bias through the matmul, zero-pad the remaining rows/lanes."""
    B, state_dim = x.shape
    xt = jnp.zeros((SD_PAD, padded_batch), jnp.float32)
    xt = xt.at[:state_dim, :B].set(x.T.astype(jnp.float32))
    xt = xt.at[state_dim, :].set(1.0)
    return xt


def critic_forward(x, params, *, batch_tile=4096, single_call_rows=512):
    """Critic forward: relu(x @ W1^T + b1) @ w2^T + b2  ->  (B, 1)."""
    B, state_dim = x.shape
    p_rows, hidden = params.shape
    assert p_rows == hidden + 1
    assert state_dim + 1 <= SD_PAD

    if B <= single_call_rows:
        # Rollout-sized batches: single un-gridded call (no 1-point pipeline
        # prologue / double buffering).  Launch overhead dominates here anyway.
        Bp = max(_round_up(B, 128), 128)
        xt = _prep_x(x, Bp)
        out = pl.pallas_call(
            critic_kernel,
            out_shape=jax.ShapeDtypeStruct((1, Bp), jnp.float32),
            in_specs=[
                pl.BlockSpec(memory_space=pltpu.MemorySpace.VMEM),  # x (transposed, lane-dense)
                pl.BlockSpec(memory_space=pltpu.MemorySpace.VMEM),  # packed params
            ],
            out_specs=pl.BlockSpec(memory_space=pltpu.MemorySpace.VMEM),
        )(xt, params)
    else:
        # Batch grid along the lane axis.  Cap the tile at ceil(B/2) (rounded to
        # the 128-lane quantum) so there are always >= 2 "parallel" steps for
        # v7x's two TensorCores; otherwise use a large tile to amortize the
        # ~0.35 us per-step pipeline overhead.
        tile = min(batch_tile, _round_up(pl.cdiv(B, 2), 128))
        Bp = _round_up(B, tile)
        xt = _prep_x(x, Bp)
        out = pl.pallas_call(
            critic_kernel,
            out_shape=jax.ShapeDtypeStruct((1, Bp), jnp.float32),
            grid=(Bp // tile,),
            in_specs=[
                pl.BlockSpec((SD_PAD, tile), lambda i: (0, i)),         # x tile
                pl.BlockSpec((hidden + 1, hidden), lambda i: (0, 0)),   # params, VMEM-resident
            ],
            out_specs=pl.BlockSpec((1, tile), lambda i: (0, i)),        # lane-dense output row
            compiler_params=pltpu.CompilerParams(
                dimension_semantics=("parallel",),
            ),
        )(xt, params)
    return out[0, :B].reshape(B, 1)


if __name__ == "__main__":
    state_dim = 4      # CartPole-v1 observation dim
    hidden_dim = 64
    batch = 8

    key = jax.random.PRNGKey(0)
    kx, k1, k2, k3, k4 = jax.random.split(key, 5)

    # PyTorch nn.Linear default init: U(-1/sqrt(fan_in), 1/sqrt(fan_in)),
    # weights in PyTorch layout [out_features, in_features].
    bnd1 = 1.0 / (state_dim ** 0.5)
    bnd2 = 1.0 / (hidden_dim ** 0.5)
    fc1_w = jax.random.uniform(k1, (hidden_dim, state_dim), jnp.float32, -bnd1, bnd1)
    fc1_b = jax.random.uniform(k2, (hidden_dim,), jnp.float32, -bnd1, bnd1)
    fc2_w = jax.random.uniform(k3, (1, hidden_dim), jnp.float32, -bnd2, bnd2)
    fc2_b = jax.random.uniform(k4, (1,), jnp.float32, -bnd2, bnd2)

    x = jax.random.normal(kx, (batch, state_dim), dtype=jnp.float32)

    params = pack_critic_params(fc1_w, fc1_b, fc2_w, fc2_b)
    critic = jax.jit(critic_forward)

    # Small (rollout-style) batch: un-gridded path.
    out = jax.block_until_ready(critic(x, params))
    ref = jnp.maximum(x @ fc1_w.T + fc1_b, 0.0) @ fc2_w.T + fc2_b
    assert out.shape == (batch, 1)
    assert jnp.allclose(out, ref, atol=1e-4, rtol=1e-4), float(jnp.max(jnp.abs(out - ref)))

    # Larger batch: exercises the tiled, megacore-parallel grid path (2 steps).
    big_batch = 1024
    xb = jax.random.normal(kx, (big_batch, state_dim), dtype=jnp.float32)
    outb = jax.block_until_ready(critic(xb, params))
    refb = jnp.maximum(xb @ fc1_w.T + fc1_b, 0.0) @ fc2_w.T + fc2_b
    assert outb.shape == (big_batch, 1)
    assert jnp.allclose(outb, refb, atol=1e-4, rtol=1e-4), float(jnp.max(jnp.abs(outb - refb)))

    print("KERNEL_OK")
</pallas_src>

<mosaic_0001>
module attributes {stable_mosaic.version = 11 : i64} {
  func.func @critic_kernel(%arg0: memref<8x128xf32, #tpu.memory_space<vmem>>, %arg1: memref<65x64xf32, #tpu.memory_space<vmem>>, %arg2: memref<1x128xf32, #tpu.memory_space<vmem>>) attributes {dimension_semantics = [], scalar_prefetch = 0 : i64, scratch_operands = 0 : i64, tpu.core_type = #tpu.core_type<tc>} {
    %c0 = arith.constant 0 : index
    %c0_0 = arith.constant 0 : index
    %0 = vector.load %arg0[%c0, %c0_0] : memref<8x128xf32, #tpu.memory_space<vmem>>, vector<8x128xf32>
    %c0_1 = arith.constant 0 : index
    %c0_2 = arith.constant 0 : index
    %1 = vector.load %arg1[%c0_1, %c0_2] : memref<65x64xf32, #tpu.memory_space<vmem>>, vector<64x8xf32>
    %c64 = arith.constant 64 : index
    %c0_3 = arith.constant 0 : index
    %2 = vector.load %arg1[%c64, %c0_3] : memref<65x64xf32, #tpu.memory_space<vmem>>, vector<1x64xf32>
    %c0_4 = arith.constant 0 : index
    %c8 = arith.constant 8 : index
    %3 = vector.load %arg1[%c0_4, %c8] : memref<65x64xf32, #tpu.memory_space<vmem>>, vector<1x1xf32>
    %cst = arith.constant dense<0.000000e+00> : vector<64x128xf32>
    %4 = tpu.matmul %1, %0, %cst {dimension_numbers = #tpu.dot_dimension_numbers<[1], [0], [0], [1], [0, 0, 1, 1], [], []>} : vector<64x8xf32>, vector<8x128xf32>, vector<64x128xf32> -> vector<64x128xf32>
    %cst_5 = arith.constant 0.000000e+00 : f32
    %5 = vector.broadcast %cst_5 : f32 to vector<64x128xf32>
    %6 = arith.maximumf %4, %5 : vector<64x128xf32>
    %cst_6 = arith.constant dense<0.000000e+00> : vector<1x128xf32>
    %7 = tpu.matmul %2, %6, %cst_6 {dimension_numbers = #tpu.dot_dimension_numbers<[1], [0], [0], [1], [0, 0, 1, 1], [], []>} : vector<1x64xf32>, vector<64x128xf32>, vector<1x128xf32> -> vector<1x128xf32>
    %8 = vector.broadcast %3 : vector<1x1xf32> to vector<1x128xf32>
    %9 = arith.addf %7, %8 : vector<1x128xf32>
    %c0_7 = arith.constant 0 : index
    %c0_8 = arith.constant 0 : index
    %10 = vector.load %arg2[%c0_7, %c0_8] : memref<1x128xf32, #tpu.memory_space<vmem>>, vector<1x128xf32>
    tpu.vector_store %arg2[%c0_7, %c0_8], %9 {strides = array<i32>} : memref<1x128xf32, #tpu.memory_space<vmem>>, vector<1x128xf32>,
    return
  }
}

</mosaic_0001>

<bundles_post_ra>
// kernel: critic_forward.1
= control target key start
LH: loop header
LB: loop body
LE: loop exit
PB: predicated region body
PF: predicated region fallthrough
CT: control target
= control target key end

     0   :  { %vm22_vm0 = vcmask 64512   ;;  %v321_v9 = vmov 0.0|0.0   ;;  %vm322_vm1 = vmmov 0   ;;  %v323_v10 = vmov 0.0   ;;  %s384_s0 = inlined_call_operand.vmem [shape: f32[8,128], index: 0, kind: input, shape index: {}]   ;;  %s385_s1 = inlined_call_operand.vmem [shape: f32[65,64], index: 1, kind: input, shape index: {}]   ;;  %s386_s2 = inlined_call_operand.vmem [shape: f32[1,128], index: 2, kind: output, shape index: {}]  }
   0x1   :  { %v11_v0 = vld [vmem:[%s384_s0] sm:$0xff]  ;;  %v13_v2 = vld [vmem:[%s385_s1 + $0x8] sm:$0xff]  ;;  %v14_v3 = vld [vmem:[%s385_s1 + $0x10] sm:$0xff]  ;;  %304 = vmatprep.subr.bf16.mxu1 %v321_v9  ;;  %301 = vmatprep.mubr.msk.f32.mxu1 %vm322_vm1, %v323_v10  ;;  %v324_v12 = vmov 8   ;;  %vm165_vm2 = vcmask 523264  }
   0x2   :  { %v12_v1 = vld [vmem:[%s385_s1] sm:$0xff]  ;;  %271 = vmatprep.subr.mxu0 %v11_v0  ;;  %v15_v4 = vld [vmem:[%s385_s1 + $0x18] sm:$0xff]  ;;  %v17_v6 = vld [vmem:[%s385_s1 + $0x28] sm:$0xff]  ;;  %320 = vset.pattern.permute.xlu0 %v324_v12 }
   0x3   :  { %273 = vmatprep.mubr.msk.f32.mxu0 %vm22_vm0, %v12_v1  ;;  %272 = vmatpush3.msra.mxu0 %v11_v0  ;;  %v16_v5 = vld [vmem:[%s385_s1 + $0x20] sm:$0xff]  ;;  %v18_v7 = vld [vmem:[%s385_s1 + $0x30] sm:$0xff]  ;;  %v19_v8 = vld [vmem:[%s385_s1 + $0x38] sm:$0xff] }
   0x4   :  { %274 = vmatmul.mubr.msk.f32.vlgmr.msra.gmra.mrb[0].mxu0 %vm22_vm0, %v13_v2  ;;  %v21_v11 = vld [vmem:[%s385_s1] sm:$0x1] }
   0x5   :  { %276 = vmatprep.mubr.msk.f32.mxu0 %vm22_vm0, %v14_v3  ;;  %162 = vperm.xlu0 %320, %v21_v11   ;;  %v20_v33 = vld [vmem:[%s385_s1 + $0x40] sm:$0x1] }
   0x8   :  { %277 = vmatmul.mubr.msk.f32.gmra.mrb[2].mxu0 %vm22_vm0, %v15_v4 }
   0x9   :  { %279 = vmatprep.mubr.msk.f32.mxu0 %vm22_vm0, %v16_v5 }
   0xc   :  { %280 = vmatmul.mubr.msk.f32.gmra.mrb[4].mxu0 %vm22_vm0, %v17_v6 }
   0xd   :  { %282 = vmatprep.mubr.msk.f32.mxu0 %vm22_vm0, %v18_v7 }
  0x10   :  { %283 = vmatmul.mubr.msk.f32.gmra.mrb[6].mxu0 %vm22_vm0, %v19_v8 }
  0x84   :  { %v163_v34 = vpop.permute.xlu0 %162 }
  0xd7   :  { %v275_v13 = vpop.f32.mrb[0].mxu0 }
  0xd8   :  { %v153_v14 = vmax.f32 %v275_v13, 0.0  ;;  %v113_v15 = vpop.f32.mrb[1].mxu0 }
  0xd9   :  { %v152_v16 = vmax.f32 %v113_v15, 0.0 }
  0xdb   :  { %v278_v17 = vpop.f32.mrb[2].mxu0  ;;  %v305_v18 = vpack.c.bf16 %v153_v14, %v152_v16 }
  0xdc   :  { %v155_v19 = vmax.f32 %v278_v17, 0.0  ;;  %v123_v20 = vpop.f32.mrb[3].mxu0 }
  0xdd   :  { %v154_v21 = vmax.f32 %v123_v20, 0.0  ;;  %306 = vmatpush3.bf16.msra.mxu1 %v305_v18 }
  0xde   :  { %307 = vmatprep.subr.bf16.mxu1 %v321_v9 }
  0xdf   :  { %v308_v22 = vpack.c.bf16 %v155_v19, %v154_v21  ;;  %v281_v23 = vpop.f32.mrb[4].mxu0 }
  0xe0   :  { %v157_v24 = vmax.f32 %v281_v23, 0.0  ;;  %v133_v25 = vpop.f32.mrb[5].mxu0 }
  0xe1   :  { %v156_v26 = vmax.f32 %v133_v25, 0.0  ;;  %309 = vmatpush3.bf16.msra.mxu1 %v308_v22 }
  0xe2   :  { %310 = vmatprep.subr.bf16.mxu1 %v321_v9 }
  0xe3   :  { %v311_v27 = vpack.c.bf16 %v157_v24, %v156_v26  ;;  %v284_v28 = vpop.f32.mrb[6].mxu0 }
  0xe4   :  { %v159_v29 = vmax.f32 %v284_v28, 0.0  ;;  %v143_v30 = vpop.f32.mrb[7].mxu0 }
  0xe5   :  { %v158_v31 = vmax.f32 %v143_v30, 0.0  ;;  %312 = vmatpush3.bf16.msra.mxu1 %v311_v27 }
  0xe6   :  { %313 = vmatprep.subr.bf16.mxu1 %v321_v9 }
  0xe7   :  { %v314_v32 = vpack.c.bf16 %v159_v29, %v158_v31 }
  0xe9   :  { %315 = vmatpush3.bf16.msra.mxu1 %v314_v32 }
  0xec   :  { %302 = vmatmul.mubr.msk.f32.vlgmr.msra.gmra.mrb[0].mxu1 %vm165_vm2, %v20_v33 }
 0x1bf   :  { %v235_v35 = vpop.f32.mrb[0].mxu1 }
 0x1c0   :  { %v236_v36 = vadd.f32 %v235_v35, %v163_v34  ;;  %v303_v37 = vpop.f32.mrb[1].mxu1 }
 0x1c2   :  { %239 = vst [vmem:[%s386_s2] sm:$0x1] %v236_v36 }

</bundles_post_ra>
